<compile_context>
chip_gen: v7x
topology: tpu7x:2x2x1
jax: 0.10.0
libtpu: 0.0.40
codegen_flags: <defaults>
</compile_context>

<pallas_src>
import jax
import jax.numpy as jnp
from jax.experimental import pallas as pl
from jax.experimental.pallas import tpu as pltpu

# Lane-dense packed norms output: [mask.norm(1), embedded_x.norm(2), masked.norm(2), 0, ...]
_NORM_LANES = 128


def csn_kernel(x_ref, w_ref, b_ref, masks_ref, c_ref,
               masked_ref, norms_ref, acc_ref):
    k = pl.program_id(0)

    # --- init accumulator on the first K tile --------------------------------
    @pl.when(k == 0)
    def _():
        acc_ref[...] = jnp.zeros_like(acc_ref)

    # --- embeddingnet partial matmul (bf16 operands, f32 accumulation) -------
    acc_ref[...] += jnp.dot(x_ref[...], w_ref[...],
                            preferred_element_type=jnp.float32)

    # --- finalize on the last K tile ------------------------------------------
    @pl.when(k == pl.num_programs(0) - 1)
    def _():
        emb = acc_ref[...] + b_ref[...]                        # (B, E) f32

        # mask = relu(Embedding(c)): unrolled VPU select over n_conditions
        # (avoids a K=4 padded one-hot MXU matmul and its awkward layout).
        c = c_ref[...]                                         # (B, 1) int32
        n_cond = masks_ref.shape[0]
        mask = jnp.zeros_like(emb)
        for cond in range(n_cond):
            row = masks_ref[cond, :]                           # (E,) f32, static row
            mask = jnp.where(c == cond, row, mask)
        mask = jnp.maximum(mask, 0.0)                          # learnedmask relu
        # NOTE: out-of-range c yields a zero mask (PyTorch Embedding would error).

        masked = emb * mask
        masked_ref[...] = masked

        l1 = jnp.sum(jnp.abs(mask))                            # mask.norm(1)
        l2e = jnp.sqrt(jnp.sum(emb * emb))                     # embedded_x.norm(2)
        l2m = jnp.sqrt(jnp.sum(masked * masked))               # masked.norm(2)
        lane = jax.lax.broadcasted_iota(jnp.int32, (1, _NORM_LANES), 1)
        norms_ref[...] = (jnp.where(lane == 0, l1, 0.0)
                          + jnp.where(lane == 1, l2e, 0.0)
                          + jnp.where(lane == 2, l2m, 0.0))


def _pick_tk(din, tk):
    """Largest multiple of 128 that divides din and is <= tk (fallback: din)."""
    if din % 128 != 0:
        return din
    tk = max(128, (min(tk, din) // 128) * 128)
    while tk > 128 and din % tk != 0:
        tk -= 128
    return tk if din % tk == 0 else din


def conditional_simnet_forward(x, c, w_bf16, b, masks_w, *, tk=512):
    """x: (B,C,H,W) f32, c: (B,) int32, w_bf16: (Din,E) bf16 (stored in kernel
    dtype), b: (1,E) f32, masks_w: (n_conditions,E) f32.  Returns
    (masked_embedding (B,E) f32, mask.norm(1), embedded_x.norm(2), masked.norm(2))."""
    B = x.shape[0]
    Din, E = w_bf16.shape
    n_cond = masks_w.shape[0]

    x_flat = x.reshape(B, -1).astype(jnp.bfloat16)             # (B, Din)
    c2d = c.reshape(B, 1).astype(jnp.int32)

    tk = _pick_tk(Din, tk)
    n_k = Din // tk

    cost = pl.CostEstimate(
        flops=2 * B * Din * E,
        transcendentals=0,
        bytes_accessed=(B * Din * 2 + Din * E * 2 + E * 4
                        + n_cond * E * 4 + B * 4 + B * E * 4 + _NORM_LANES * 4),
    )

    masked, norms = pl.pallas_call(
        csn_kernel,
        grid=(n_k,),
        in_specs=[
            pl.BlockSpec((B, tk), lambda k: (0, k)),           # x (bf16)
            pl.BlockSpec((tk, E), lambda k: (k, 0)),           # w (bf16, streamed over K)
            pl.BlockSpec((1, E), lambda k: (0, 0)),            # bias (f32)
            pl.BlockSpec((n_cond, E), lambda k: (0, 0)),       # mask table (f32)
            pl.BlockSpec((B, 1), lambda k: (0, 0)),            # condition ids (int32)
        ],
        out_specs=(
            pl.BlockSpec((B, E), lambda k: (0, 0)),            # masked embedding
            pl.BlockSpec((1, _NORM_LANES), lambda k: (0, 0)),  # packed norms (lane-dense)
        ),
        out_shape=(
            jax.ShapeDtypeStruct((B, E), jnp.float32),
            jax.ShapeDtypeStruct((1, _NORM_LANES), jnp.float32),
        ),
        scratch_shapes=[pltpu.VMEM((B, E), jnp.float32)],      # f32 accumulator
        compiler_params=pltpu.CompilerParams(
            dimension_semantics=("arbitrary",)),               # K is a reduction axis
        cost_estimate=cost,
    )(x_flat, w_bf16, b.astype(jnp.float32),
      masks_w.astype(jnp.float32), c2d)
    return masked, norms[0, 0], norms[0, 1], norms[0, 2]


def _reference(x, c, w, b, masks_w):
    B = x.shape[0]
    emb = jnp.dot(x.reshape(B, -1), w,
                  precision=jax.lax.Precision.HIGHEST) + b
    mask = jnp.maximum(masks_w[c], 0.0)
    masked = emb * mask
    return (masked,
            jnp.sum(jnp.abs(mask)),
            jnp.sqrt(jnp.sum(emb ** 2)),
            jnp.sqrt(jnp.sum(masked ** 2)))


if __name__ == "__main__":
    # Small shapes consistent with the module.
    B, C, H, W = 2, 4, 16, 16
    n_conditions = 4
    embedding_size = 128
    Din = C * H * W

    key = jax.random.PRNGKey(0)
    kx, kc, kw, kb, km = jax.random.split(key, 5)

    x = jax.random.normal(kx, (B, C, H, W), dtype=jnp.float32)
    c = jax.random.randint(kc, (B,), 0, n_conditions, dtype=jnp.int32)

    # embeddingnet parameters (deterministic, synthetic)
    w = 0.02 * jax.random.normal(kw, (Din, embedding_size), dtype=jnp.float32)
    b = 0.01 * jax.random.normal(kb, (1, embedding_size), dtype=jnp.float32)
    # masks: learnedmask=True, prein=False  ->  Normal(mean=0.9, std=0.7)
    masks_w = 0.9 + 0.7 * jax.random.normal(
        km, (n_conditions, embedding_size), dtype=jnp.float32)

    # Weights are stored in the kernel's matmul dtype (bf16) once, up front,
    # so there is no per-call full-weight astype/copy in HBM.
    w_bf16 = w.astype(jnp.bfloat16)

    out = conditional_simnet_forward(x, c, w_bf16, b, masks_w)
    out = jax.block_until_ready(out)

    ref = _reference(x, c, w, b, masks_w)
    # bf16 matmul operands with f32 accumulation -> loosened tolerance.
    for got, want in zip(out, ref):
        assert jnp.allclose(got, want, rtol=2e-2, atol=2e-2), (got, want)

    print("KERNEL_OK")
</pallas_src>

<mosaic_0001>
module attributes {stable_mosaic.version = 11 : i64} {
  func.func @csn_kernel(%arg0: i32, %arg1: memref<2x512xbf16, #tpu.memory_space<vmem>>, %arg2: memref<512x128xbf16, #tpu.memory_space<vmem>>, %arg3: memref<1x128xf32, #tpu.memory_space<vmem>>, %arg4: memref<4x128xf32, #tpu.memory_space<vmem>>, %arg5: memref<2x1xi32, #tpu.memory_space<vmem>>, %arg6: memref<2x128xf32, #tpu.memory_space<vmem>>, %arg7: memref<1x128xf32, #tpu.memory_space<vmem>>, %arg8: memref<2x128xf32, #tpu.memory_space<vmem>>) attributes {dimension_semantics = [#tpu.dimension_semantics<arbitrary>], iteration_bounds = array<i64: 2>, scalar_prefetch = 0 : i64, scratch_operands = 1 : i64, tpu.core_type = #tpu.core_type<tc>, window_params = [{transform_indices = @transform_0, window_bounds = array<i64: 2, 512>}, {transform_indices = @transform_1, window_bounds = array<i64: 512, 128>}, {pipeline_mode = #tpu.pipeline_mode<synchronous>, transform_indices = @transform_2, window_bounds = array<i64: 1, 128>}, {pipeline_mode = #tpu.pipeline_mode<synchronous>, transform_indices = @transform_3, window_bounds = array<i64: 4, 128>}, {pipeline_mode = #tpu.pipeline_mode<synchronous>, transform_indices = @transform_4, window_bounds = array<i64: 2, 1>}, {pipeline_mode = #tpu.pipeline_mode<synchronous>, transform_indices = @transform_5, window_bounds = array<i64: 2, 128>}, {pipeline_mode = #tpu.pipeline_mode<synchronous>, transform_indices = @transform_6, window_bounds = array<i64: 1, 128>}]} {
    %c0_i32 = arith.constant 0 : i32
    %0 = arith.cmpi eq, %arg0, %c0_i32 : i32
    %1 = arith.extui %0 : i1 to i32
    %c0_i32_0 = arith.constant 0 : i32
    %2 = arith.cmpi ne, %1, %c0_i32_0 : i32
    scf.if %2 {
      %cst_9 = arith.constant 0.000000e+00 : f32
      %12 = vector.broadcast %cst_9 : f32 to vector<2x128xf32>
      %c0_10 = arith.constant 0 : index
      %c0_11 = arith.constant 0 : index
      %13 = vector.load %arg8[%c0_10, %c0_11] : memref<2x128xf32, #tpu.memory_space<vmem>>, vector<2x128xf32>
      tpu.vector_store %arg8[%c0_10, %c0_11], %12 {strides = array<i32>} : memref<2x128xf32, #tpu.memory_space<vmem>>, vector<2x128xf32>,
    } else {
    }
    %c0 = arith.constant 0 : index
    %c0_1 = arith.constant 0 : index
    %3 = vector.load %arg8[%c0, %c0_1] : memref<2x128xf32, #tpu.memory_space<vmem>>, vector<2x128xf32>
    %c0_2 = arith.constant 0 : index
    %c0_3 = arith.constant 0 : index
    %4 = vector.load %arg1[%c0_2, %c0_3] : memref<2x512xbf16, #tpu.memory_space<vmem>>, vector<2x512xbf16>
    %c0_4 = arith.constant 0 : index
    %c0_5 = arith.constant 0 : index
    %5 = vector.load %arg2[%c0_4, %c0_5] : memref<512x128xbf16, #tpu.memory_space<vmem>>, vector<512x128xbf16>
    %cst = arith.constant dense<0.000000e+00> : vector<2x128xf32>
    %6 = tpu.matmul %4, %5, %cst {dimension_numbers = #tpu.dot_dimension_numbers<[1], [0], [0], [1], [0, 0, 1, 1], [], []>} : vector<2x512xbf16>, vector<512x128xbf16>, vector<2x128xf32> -> vector<2x128xf32>
    %7 = arith.addf %3, %6 : vector<2x128xf32>
    %c0_6 = arith.constant 0 : index
    %c0_7 = arith.constant 0 : index
    %8 = vector.load %arg8[%c0_6, %c0_7] : memref<2x128xf32, #tpu.memory_space<vmem>>, vector<2x128xf32>
    tpu.vector_store %arg8[%c0_6, %c0_7], %7 {strides = array<i32>} : memref<2x128xf32, #tpu.memory_space<vmem>>, vector<2x128xf32>,
    %c1_i32 = arith.constant 1 : i32
    %9 = arith.cmpi eq, %arg0, %c1_i32 : i32
    %10 = arith.extui %9 : i1 to i32
    %c0_i32_8 = arith.constant 0 : i32
    %11 = arith.cmpi ne, %10, %c0_i32_8 : i32
    scf.if %11 {
      %c0_9 = arith.constant 0 : index
      %c0_10 = arith.constant 0 : index
      %12 = vector.load %arg8[%c0_9, %c0_10] : memref<2x128xf32, #tpu.memory_space<vmem>>, vector<2x128xf32>
      %c0_11 = arith.constant 0 : index
      %c0_12 = arith.constant 0 : index
      %13 = vector.load %arg3[%c0_11, %c0_12] : memref<1x128xf32, #tpu.memory_space<vmem>>, vector<1x128xf32>
      %14 = vector.broadcast %13 : vector<1x128xf32> to vector<2x128xf32>
      %15 = arith.addf %12, %14 : vector<2x128xf32>
      %c0_13 = arith.constant 0 : index
      %c0_14 = arith.constant 0 : index
      %16 = vector.load %arg5[%c0_13, %c0_14] : memref<2x1xi32, #tpu.memory_space<vmem>>, vector<2x1xi32>
      %cst_15 = arith.constant 0.000000e+00 : f32
      %17 = vector.broadcast %cst_15 : f32 to vector<2x128xf32>
      %c0_16 = arith.constant 0 : index
      %c0_17 = arith.constant 0 : index
      %18 = vector.load %arg4[%c0_16, %c0_17] : memref<4x128xf32, #tpu.memory_space<vmem>>, vector<1x128xf32>
      %19 = vector.shape_cast %18 : vector<1x128xf32> to vector<128xf32>
      %c0_i32_18 = arith.constant 0 : i32
      %20 = vector.broadcast %c0_i32_18 : i32 to vector<2x1xi32>
      %21 = arith.cmpi eq, %16, %20 : vector<2x1xi32>
      %22 = vector.shape_cast %21 : vector<2x1xi1> to vector<2x1xi1>
      %23 = vector.broadcast %22 : vector<2x1xi1> to vector<2x128xi1>
      %24 = vector.shape_cast %19 : vector<128xf32> to vector<1x128xf32>
      %25 = vector.broadcast %24 : vector<1x128xf32> to vector<2x128xf32>
      %26 = arith.select %23, %25, %17 : vector<2x128xi1>, vector<2x128xf32>
      %c1 = arith.constant 1 : index
      %c0_19 = arith.constant 0 : index
      %27 = vector.load %arg4[%c1, %c0_19] : memref<4x128xf32, #tpu.memory_space<vmem>>, vector<1x128xf32>
      %28 = vector.shape_cast %27 : vector<1x128xf32> to vector<128xf32>
      %c1_i32_20 = arith.constant 1 : i32
      %29 = vector.broadcast %c1_i32_20 : i32 to vector<2x1xi32>
      %30 = arith.cmpi eq, %16, %29 : vector<2x1xi32>
      %31 = vector.shape_cast %30 : vector<2x1xi1> to vector<2x1xi1>
      %32 = vector.broadcast %31 : vector<2x1xi1> to vector<2x128xi1>
      %33 = vector.shape_cast %28 : vector<128xf32> to vector<1x128xf32>
      %34 = vector.broadcast %33 : vector<1x128xf32> to vector<2x128xf32>
      %35 = arith.select %32, %34, %26 : vector<2x128xi1>, vector<2x128xf32>
      %c2 = arith.constant 2 : index
      %c0_21 = arith.constant 0 : index
      %36 = vector.load %arg4[%c2, %c0_21] : memref<4x128xf32, #tpu.memory_space<vmem>>, vector<1x128xf32>
      %37 = vector.shape_cast %36 : vector<1x128xf32> to vector<128xf32>
      %c2_i32 = arith.constant 2 : i32
      %38 = vector.broadcast %c2_i32 : i32 to vector<2x1xi32>
      %39 = arith.cmpi eq, %16, %38 : vector<2x1xi32>
      %40 = vector.shape_cast %39 : vector<2x1xi1> to vector<2x1xi1>
      %41 = vector.broadcast %40 : vector<2x1xi1> to vector<2x128xi1>
      %42 = vector.shape_cast %37 : vector<128xf32> to vector<1x128xf32>
      %43 = vector.broadcast %42 : vector<1x128xf32> to vector<2x128xf32>
      %44 = arith.select %41, %43, %35 : vector<2x128xi1>, vector<2x128xf32>
      %c3 = arith.constant 3 : index
      %c0_22 = arith.constant 0 : index
      %45 = vector.load %arg4[%c3, %c0_22] : memref<4x128xf32, #tpu.memory_space<vmem>>, vector<1x128xf32>
      %46 = vector.shape_cast %45 : vector<1x128xf32> to vector<128xf32>
      %c3_i32 = arith.constant 3 : i32
      %47 = vector.broadcast %c3_i32 : i32 to vector<2x1xi32>
      %48 = arith.cmpi eq, %16, %47 : vector<2x1xi32>
      %49 = vector.shape_cast %48 : vector<2x1xi1> to vector<2x1xi1>
      %50 = vector.broadcast %49 : vector<2x1xi1> to vector<2x128xi1>
      %51 = vector.shape_cast %46 : vector<128xf32> to vector<1x128xf32>
      %52 = vector.broadcast %51 : vector<1x128xf32> to vector<2x128xf32>
      %53 = arith.select %50, %52, %44 : vector<2x128xi1>, vector<2x128xf32>
      %cst_23 = arith.constant 0.000000e+00 : f32
      %54 = vector.broadcast %cst_23 : f32 to vector<2x128xf32>
      %55 = arith.maximumf %53, %54 : vector<2x128xf32>
      %56 = arith.mulf %15, %55 : vector<2x128xf32>
      %c0_24 = arith.constant 0 : index
      %c0_25 = arith.constant 0 : index
      %57 = vector.load %arg6[%c0_24, %c0_25] : memref<2x128xf32, #tpu.memory_space<vmem>>, vector<2x128xf32>
      tpu.vector_store %arg6[%c0_24, %c0_25], %56 {strides = array<i32>} : memref<2x128xf32, #tpu.memory_space<vmem>>, vector<2x128xf32>,
      %58 = math.absf %55 : vector<2x128xf32>
      %59 = vector.shape_cast %58 : vector<2x128xf32> to vector<1x2x128xf32>
      %cst_26 = arith.constant dense<0.000000e+00> : vector<1xf32>
      %60 = vector.multi_reduction <add>, %59, %cst_26 [1, 2] : vector<1x2x128xf32> to vector<1xf32>
      %61 = vector.shape_cast %60 : vector<1xf32> to vector<1x1x1xf32>
      %62 = vector.extract %61[0, 0, 0] : f32 from vector<1x1x1xf32>
      %63 = arith.mulf %15, %15 : vector<2x128xf32>
      %64 = vector.shape_cast %63 : vector<2x128xf32> to vector<1x2x128xf32>
      %cst_27 = arith.constant dense<0.000000e+00> : vector<1xf32>
      %65 = vector.multi_reduction <add>, %64, %cst_27 [1, 2] : vector<1x2x128xf32> to vector<1xf32>
      %66 = vector.shape_cast %65 : vector<1xf32> to vector<1x1x1xf32>
      %67 = vector.extract %66[0, 0, 0] : f32 from vector<1x1x1xf32>
      %68 = math.sqrt %67 : f32
      %69 = arith.mulf %56, %56 : vector<2x128xf32>
      %70 = vector.shape_cast %69 : vector<2x128xf32> to vector<1x2x128xf32>
      %cst_28 = arith.constant dense<0.000000e+00> : vector<1xf32>
      %71 = vector.multi_reduction <add>, %70, %cst_28 [1, 2] : vector<1x2x128xf32> to vector<1xf32>
      %72 = vector.shape_cast %71 : vector<1xf32> to vector<1x1x1xf32>
      %73 = vector.extract %72[0, 0, 0] : f32 from vector<1x1x1xf32>
      %74 = math.sqrt %73 : f32
      %75 = tpu.iota {dimensions = array<i32: 1>} : vector<1x128xi32>
      %c0_i32_29 = arith.constant 0 : i32
      %76 = vector.broadcast %c0_i32_29 : i32 to vector<1x128xi32>
      %77 = arith.cmpi eq, %75, %76 : vector<1x128xi32>
      %cst_30 = arith.constant 0.000000e+00 : f32
      %78 = vector.broadcast %62 : f32 to vector<1x128xf32>
      %79 = vector.broadcast %cst_30 : f32 to vector<1x128xf32>
      %80 = arith.select %77, %78, %79 : vector<1x128xi1>, vector<1x128xf32>
      %c1_i32_31 = arith.constant 1 : i32
      %81 = vector.broadcast %c1_i32_31 : i32 to vector<1x128xi32>
      %82 = arith.cmpi eq, %75, %81 : vector<1x128xi32>
      %cst_32 = arith.constant 0.000000e+00 : f32
      %83 = vector.broadcast %68 : f32 to vector<1x128xf32>
      %84 = vector.broadcast %cst_32 : f32 to vector<1x128xf32>
      %85 = arith.select %82, %83, %84 : vector<1x128xi1>, vector<1x128xf32>
      %86 = arith.addf %80, %85 : vector<1x128xf32>
      %c2_i32_33 = arith.constant 2 : i32
      %87 = vector.broadcast %c2_i32_33 : i32 to vector<1x128xi32>
      %88 = arith.cmpi eq, %75, %87 : vector<1x128xi32>
      %cst_34 = arith.constant 0.000000e+00 : f32
      %89 = vector.broadcast %74 : f32 to vector<1x128xf32>
      %90 = vector.broadcast %cst_34 : f32 to vector<1x128xf32>
      %91 = arith.select %88, %89, %90 : vector<1x128xi1>, vector<1x128xf32>
      %92 = arith.addf %86, %91 : vector<1x128xf32>
      %c0_35 = arith.constant 0 : index
      %c0_36 = arith.constant 0 : index
      %93 = vector.load %arg7[%c0_35, %c0_36] : memref<1x128xf32, #tpu.memory_space<vmem>>, vector<1x128xf32>
      tpu.vector_store %arg7[%c0_35, %c0_36], %92 {strides = array<i32>} : memref<1x128xf32, #tpu.memory_space<vmem>>, vector<1x128xf32>,
    } else {
    }
    return
  }
  func.func @transform_0(%arg0: i32) -> (i32, i32) {
    %c0_i32 = arith.constant 0 : i32
    %c0_i32_0 = arith.constant 0 : i32
    return %c0_i32, %arg0 : i32, i32
  }
  func.func @transform_1(%arg0: i32) -> (i32, i32) {
    %c0_i32 = arith.constant 0 : i32
    %c0_i32_0 = arith.constant 0 : i32
    return %arg0, %c0_i32 : i32, i32
  }
  func.func @transform_2(%arg0: i32) -> (i32, i32) {
    %c0_i32 = arith.constant 0 : i32
    %c0_i32_0 = arith.constant 0 : i32
    %c0_i32_1 = arith.constant 0 : i32
    return %c0_i32, %c0_i32_0 : i32, i32
  }
  func.func @transform_3(%arg0: i32) -> (i32, i32) {
    %c0_i32 = arith.constant 0 : i32
    %c0_i32_0 = arith.constant 0 : i32
    %c0_i32_1 = arith.constant 0 : i32
    return %c0_i32, %c0_i32_0 : i32, i32
  }
  func.func @transform_4(%arg0: i32) -> (i32, i32) {
    %c0_i32 = arith.constant 0 : i32
    %c0_i32_0 = arith.constant 0 : i32
    %c0_i32_1 = arith.constant 0 : i32
    return %c0_i32, %c0_i32_0 : i32, i32
  }
  func.func @transform_5(%arg0: i32) -> (i32, i32) {
    %c0_i32 = arith.constant 0 : i32
    %c0_i32_0 = arith.constant 0 : i32
    %c0_i32_1 = arith.constant 0 : i32
    return %c0_i32, %c0_i32_0 : i32, i32
  }
  func.func @transform_6(%arg0: i32) -> (i32, i32) {
    %c0_i32 = arith.constant 0 : i32
    %c0_i32_0 = arith.constant 0 : i32
    %c0_i32_1 = arith.constant 0 : i32
    return %c0_i32, %c0_i32_0 : i32, i32
  }
}

</mosaic_0001>

<bundles_post_ra>
// kernel: tpu_custom_call.1
= control target key start
LH: loop header
LB: loop body
LE: loop exit
PB: predicated region body
PF: predicated region fallthrough
CT: control target
= control target key end

     0   :  { %12 = vsyncpa [#allocation4], 0  ;;  %s1582_s0 = inlined_call_operand.hbm [shape: bf16[2,1024], index: 0, kind: input, shape index: {}]   ;;  %s1583_s1 = inlined_call_operand.hbm [shape: bf16[1024,128], index: 1, kind: input, shape index: {}]   ;;  %s1584_s2 = inlined_call_operand.vmem [shape: f32[1,128], index: 2, kind: input, shape index: {}]   ;;  %s1585_s3 = inlined_call_operand.vmem [shape: f32[4,128], index: 3, kind: input, shape index: {}]   ;;  %s1586_s4 = inlined_call_operand.vmem [shape: s32[2,1], index: 4, kind: input, shape index: {}]   ;;  %s1587_s5 = inlined_call_operand.hbm [shape: f32[2,128], index: 5, kind: output, shape index: {0}]   ;;  %s1588_s6 = inlined_call_operand.hbm [shape: f32[1,128], index: 6, kind: output, shape index: {1}]  }
   0x1   :  { %14 = vsyncpa [#allocation4 + $0x1], 0 }
   0x2   :  { %15 = vsyncpa [#allocation7], 0 }
   0x3   :  { %17 = vsyncpa [#allocation7 + $0x1], 0 }
   0x4   :  { %18 = vsyncpa [#allocation5], 0 }
   0x5   :  { %19 = vsyncpa [#allocation10], 0  ;;  %s1324_s21 = smov 0   ;;  %s1326_s22 = smov 0  }
   0x6   :  { %s1328_s23 = smov 0   ;;  %s1330_s24 = smov 0  }
   0x7 LB: > { %s1343_s25 = sadd.s32 4294967295, %s1278_s24   ;;  %s1346_s26 = sadd.s32 1, %s1278_s24   ;;  %s1278_s24 = sphi %s1330_s24, %s1599_s24   ;;  %s1274_s23 = sphi %s1328_s23, %s1598_s23   ;;  %s1270_s22 = sphi %s1326_s22, %s1597_s22   ;;  %s1266_s21 = sphi %s1324_s21, %s1596_s21  }
   0x8   : > { %s29_s27 = ssub.s32 %s1278_s24, %s1346_s26  ;;  %s32_s28 = sadd.s32 1, %s1274_s23 }
   0x9   : > { %p30_p0 = scmp.eq.s32.totalorder %s29_s27, 0  ;;  %p39_p1 = scmp.ne.s32.totalorder %s1274_s23, %s1270_s22 }
   0xa   : > { %p40_p2 = scmp.eq.s32.totalorder %s1278_s24, 0  ;;  %p45_p3 = scmp.ne.s32.totalorder %s1270_s22, %s1266_s21 }
   0xb   : > { %s1356_s29 = scalar_select %p30_p0, %s1274_s23, %s32_s28  }
   0xc   : > { %p41_p4 = por %p40_p2, %p39_p1  ;;  %p46_p5 = scmp.eq.s32.totalorder %s1343_s25, 0 }
   0xd   : > { %p1038_p6 = scmp.lt.s32.totalorder %s1278_s24, 2  ;;  %s1365_s7 = sand.u32 1, %s1274_s23  }
   0xe   : > { %p1360_p7 = por %p46_p5, %p45_p3  ;;  %s908_s8 = sshll.u32 %s1365_s7, 2 }
   0xf   : > { %s963_s9 = sshll.u32 %s1278_s24, 6  ;;  %s213_s13 = scalar_lea.vmem [#allocation3], %s908_s8 }
  0x10   : > { %s1590_s30 = scalar_select %p1360_p7, 1, 0 }
  0x11   : > { %s1372_s12 = scalar_lea.hbm %s1582_s0, %s963_s9  ;;  %s221_s14 = sshll.u32 %s213_s13, 4  ;;  %s1374_s14 = int_to_ptr.vmem [resolvable:$true] %s221_s14 }
  0x12   : > { %p1376_p8 = pnand %p1038_p6, %p41_p4  ;;  %s210_s16 = scalar_lea.sflag [#allocation4], %s1365_s7 }
  0x13   : > { %s1120_s17 = scalar_lea.hbm %s1372_s12, 64  ;;  %s1125_s20 = scalar_lea.hbm %s1582_s0, 128 }
  0x14   : > { %p1121_p11 = scmp.ne.s32.totalorder %s1372_s12, %s1120_s17  ;;  %p1122_p12 = pneg %p1376_p8 }
  0x15   : > { %p1126_p1 = scmp.lt.u32.totalorder %s1372_s12, %s1582_s0  ;;  %p1127_p2 = scmp.lt.u32.totalorder %s1125_s20, %s1120_s17 }
  0x16   : > { %p1123_p13 = pnand %p1122_p12, %p1121_p11  ;;  %p1129_p4 = scmp.lt.u32.totalorder %s1120_s17, %s1372_s12 }
  0x17   : > { %p1128_p3 = por %p1127_p2, %p1126_p1 }
  0x18   : > { %p1124_p0 = pneg %p1123_p13 }
  0x19   : > { %p1130_p5 = por %p1129_p4, %p1128_p3 }
  0x1b   : > { %p1131_p6 = pnand %p1130_p5, %p1124_p0 }
  0x1d   : > { %1134 = shalt.err (!%p1131_p6)
}
  0x1e   : > { %s1135_s28 = scalar_lea.vmem %s1374_s14, 64  ;;  %s1280_s8 = smov [#allocation3]  }
  0x1f   : > { %p1136_p11 = scmp.ne.s32.totalorder %s1374_s14, %s1135_s28  ;;  %s1140_s9 = sshll.u32 %s1280_s8, 4  ;;  %s1141_s9 = int_to_ptr.vmem [resolvable:$false] %s1140_s9 }
  0x20   : > { %s1142_s10 = scalar_lea.vmem %s1141_s9, 128  ;;  %p1143_p10 = scmp.lt.s32.totalorder %s1374_s14, %s1141_s9 }
  0x21   : > { %p1138_p13 = pnand %p1136_p11, %p1122_p12  ;;  %p1144_p1 = scmp.lt.s32.totalorder %s1142_s10, %s1135_s28 }
  0x23   : > { %p1139_p9 = pneg %p1138_p13  ;;  %p1145_p2 = por %p1144_p1, %p1143_p10 }
  0x25   : > { %p1146_p3 = pnand %p1145_p2, %p1139_p9 }
  0x27   : > { %1149 = shalt.err (!%p1146_p3)
}
  0x28   : > { %1034 = dma.hbm_to_vmem [thread:$0]  (!%p1376_p8), %s1372_s12, 64, %s1374_s14, %s210_s16  }
  0x29   : > { %p1592_p0 = scmp.lt.s32.totalorder %s1278_s24, 3  ;;  %p1593_p4 = scmp.ge.s32.totalorder %s1278_s24, 1 }
  0x2a   : > { %s911_s13 = sshll.u32 %s1365_s7, 8  ;;  %s964_s17 = sshll.u32 %s1278_s24, 12 }
  0x2b   : > { %p1412_p5 = pnand %p1593_p4, %p1592_p0  ;;  %s1421_s20 = scalar_lea.hbm %s1583_s1, %s964_s17 }
  0x2c   : > { %s232_s21 = scalar_lea.vmem [#allocation6], %s911_s13  ;;  %s229_s12 = scalar_lea.sflag [#allocation7], %s1365_s7 }
  0x2d   : > { %s239_s27 = sshll.u32 %s232_s21, 4  ;;  %s1150_s14 = scalar_lea.hbm %s1421_s20, 4096  ;;  %s1423_s27 = int_to_ptr.vmem [resolvable:$true] %s239_s27 }
  0x2e   : > { %p1151_p9 = scmp.ne.s32.totalorder %s1421_s20, %s1150_s14  ;;  %s1155_s28 = scalar_lea.hbm %s1583_s1, 8192 }
  0x2f   : > { %p1156_p11 = scmp.lt.u32.totalorder %s1421_s20, %s1583_s1  ;;  %p1157_p13 = scmp.lt.u32.totalorder %s1155_s28, %s1150_s14 }
  0x30   : > { %p1153_p10 = pnand %p1151_p9, %p1122_p12  ;;  %p1159_p2 = scmp.lt.u32.totalorder %s1150_s14, %s1421_s20 }
  0x31   : > { %p1158_p1 = por %p1157_p13, %p1156_p11 }
  0x32   : > { %p1154_p6 = pneg %p1153_p10 }
  0x33   : > { %p1160_p3 = por %p1159_p2, %p1158_p1 }
  0x35   : > { %p1161_p0 = pnand %p1160_p3, %p1154_p6 }
  0x37   : > { %1164 = shalt.err (!%p1161_p0)
}
  0x38   : > { %s1165_s10 = scalar_lea.vmem %s1423_s27, 4096  ;;  %s1281_s13 = smov [#allocation6]  }
  0x39   : > { %p1166_p4 = scmp.ne.s32.totalorder %s1423_s27, %s1165_s10  ;;  %s1170_s17 = sshll.u32 %s1281_s13, 4  ;;  %s1171_s17 = int_to_ptr.vmem [resolvable:$false] %s1170_s17 }
  0x3a   : > { %s1172_s18 = scalar_lea.vmem %s1171_s17, 8192  ;;  %p1173_p7 = scmp.lt.s32.totalorder %s1423_s27, %s1171_s17 }
  0x3b   : > { %p1168_p9 = pnand %p1166_p4, %p1122_p12  ;;  %p1174_p11 = scmp.lt.s32.totalorder %s1172_s18, %s1165_s10 }
  0x3d   : > { %p1169_p10 = pneg %p1168_p9  ;;  %p1175_p13 = por %p1174_p11, %p1173_p7 }
  0x3f   : > { %p1176_p1 = pnand %p1175_p13, %p1169_p10 }
  0x41   : > { %1179 = shalt.err (!%p1176_p1)
}
  0x42   : > { %s1282_s19 = smov 64   ;;  %s1283_s21 = smov 4  }
  0x43   : > { %1037 = dma.hbm_to_vmem [thread:$0]  (!%p1376_p8), %s1421_s20, 4096, %s1423_s27, %s229_s12, %s1282_s19, %s1282_s19, %s1283_s21  }
  0x44   : > { %251 = sbr.rel (%p1412_p5) target bundleno = 745 (0x2e9), region = 40  ;;  %s253_s14 = sand.u32 (!%p1412_p5), 1, %s1270_s22  }
  0x45   : > { %s915_s24 = sshll.u32 (!%p1412_p5), %s253_s14, 2  ;;  %s254_s16 = scalar_lea.sflag (!%p1412_p5), [#allocation4], %s253_s14 }
  0x46   : > { %s1454_s28 = scalar_lea.vmem (!%p1412_p5), [#allocation3], %s915_s24  ;;  %p1595_p7 = scmp.ne.s32.totalorder (!%p1412_p5), %s1590_s30, 0 }
  0x4b   : > { %1249 = dma.done.wait (%p1595_p7), %s254_s16, 64  }
  0x4c   : > { %1251 = vsyncadd (%p1595_p7), %s254_s16, 4294967232  ;;  %s916_s8 = sshll.u32 %s253_s14, 8  ;;  %s263_s15 = scalar_lea.sflag [#allocation7], %s253_s14 }
  0x4d   : > { %s1460_s7 = scalar_lea.vmem [#allocation6], %s916_s8 }
  0x4e   : > { %1253 = dma.done.wait (%p1595_p7), %s263_s15, 4096  }
  0x4f   : > { %1255 = vsyncadd (%p1595_p7), %s263_s15, 4294963200  ;;  %p917_p8 = scmp.ne.s32.totalorder %s1343_s25, 0 }
  0x50   : > { %v1284_v0 = vmov (!%p917_p8), 0.0  }
  0x51   : > { %301 = sbr.rel (%p917_p8) target bundleno = 88 (0x58), region = 52  ;;  %302 = vst [vmem:[#allocation2] sm:$0x3] (!%p917_p8), %v1284_v0 }
  0x58 PF: > { %v1082_v1 = vld [vmem:[%s1460_s7 + $0x40] sm:$0xff]   ;;  %v1086_v5 = vld [vmem:[%s1460_s7 + $0x48] sm:$0xff]   ;;  %v1090_v9 = vld [vmem:[%s1460_s7 + $0x50] sm:$0xff]   ;;  %v381_v31 = vlaneseq  ;;  %v1285_v35 = vmov 1966171168   ;;  %p951_p12 = scmp.ne.s32.totalorder %s1343_s25, 1 }
  0x59   : > { %v1083_v2 = vld [vmem:[%s1460_s7 + $0xc0] sm:$0xff]   ;;  %965 = vmatprep.subr.bf16.mxu0 %v1082_v1  ;;  %v1087_v6 = vld [vmem:[%s1460_s7 + $0xc8] sm:$0xff]   ;;  %v1091_v10 = vld [vmem:[%s1460_s7 + $0xd0] sm:$0xff]   ;;  %v379_v36 = vunpack.c.l.s4 %v1285_v35  ;;  %v1286_v59 = vmov (!%p951_p12), 0   ;;  %vm738_vm4 = vcmask (!%p951_p12), 1041408  }
  0x5a   : > { %v1084_v3 = vld [vmem:[%s1460_s7] sm:$0xff]   ;;  %987 = vmatprep.subr.bf16.mxu1 %v1083_v2  ;;  %v1088_v7 = vld [vmem:[%s1460_s7 + $0x8] sm:$0xff]   ;;  %v1092_v11 = vld [vmem:[%s1460_s7 + $0x10] sm:$0xff]   ;;  %v382_v37 = vshrl.u32 %v381_v31, 7  ;;  %1115 = vset.pattern.permute.xlu1 (!%p951_p12), %v1286_v59 }
  0x5b   : > { %v1085_v4 = vld [vmem:[%s1460_s7 + $0x80] sm:$0xff]   ;;  %966 = vmatpush3.bf16.msra.mxu0 %v1084_v3  ;;  %v1089_v8 = vld [vmem:[%s1460_s7 + $0x88] sm:$0xff]   ;;  %v1093_v12 = vld [vmem:[%s1460_s7 + $0x90] sm:$0xff]   ;;  %v380_v39 = vunpack.c.0.s8 %v379_v36  ;;  %1114 = vset.pattern.permute.xlu0 (!%p951_p12), %v1286_v59 }
  0x5c   : > { %988 = vmatpush3.bf16.msra.mxu1 %v1085_v4  ;;  %967 = vmatprep.subr.bf16.mxu0 %v1086_v5  ;;  %v1094_v13 = vld [vmem:[%s1460_s7 + $0x58] sm:$0xff]   ;;  %v1098_v17 = vld [vmem:[%s1460_s7 + $0x60] sm:$0xff]   ;;  %v1102_v21 = vld [vmem:[%s1460_s7 + $0x68] sm:$0xff]  }
  0x5d   : > { %989 = vmatprep.subr.bf16.mxu1 %v1087_v6  ;;  %v1095_v14 = vld [vmem:[%s1460_s7 + $0xd8] sm:$0xff]   ;;  %v1099_v18 = vld [vmem:[%s1460_s7 + $0xe0] sm:$0xff]   ;;  %v1103_v22 = vld [vmem:[%s1460_s7 + $0xe8] sm:$0xff]   ;;  %v383_v40 = vsub.s32 %v380_v39, %v382_v37 }
  0x5e   : > { %v1096_v15 = vld [vmem:[%s1460_s7 + $0x18] sm:$0xff]   ;;  %v1100_v19 = vld [vmem:[%s1460_s7 + $0x20] sm:$0xff]   ;;  %v1104_v23 = vld [vmem:[%s1460_s7 + $0x28] sm:$0xff]  }
  0x5f   : > { %968 = vmatpush3.bf16.msra.mxu0 %v1088_v7  ;;  %v1097_v16 = vld [vmem:[%s1460_s7 + $0x98] sm:$0xff]   ;;  %v1101_v20 = vld [vmem:[%s1460_s7 + $0xa0] sm:$0xff]   ;;  %v1105_v24 = vld [vmem:[%s1460_s7 + $0xa8] sm:$0xff]  }
  0x60   : > { %990 = vmatpush3.bf16.msra.mxu1 %v1089_v8  ;;  %969 = vmatprep.subr.bf16.mxu0 %v1090_v9  ;;  %v1106_v25 = vld [vmem:[%s1460_s7 + $0x70] sm:$0xff]   ;;  %v1110_v29 = vld [vmem:[%s1460_s7 + $0x78] sm:$0xff]  }
  0x61   : > { %991 = vmatprep.subr.bf16.mxu1 %v1091_v10  ;;  %v1107_v26 = vld [vmem:[%s1460_s7 + $0xf0] sm:$0xff]   ;;  %v1111_v30 = vld [vmem:[%s1460_s7 + $0xf8] sm:$0xff]  }
  0x62   : > { %v1108_v27 = vld [vmem:[%s1460_s7 + $0x30] sm:$0xff]   ;;  %v1112_v32 = vld [vmem:[%s1460_s7 + $0x38] sm:$0xff]  }
  0x63   : > { %970 = vmatpush3.bf16.msra.mxu0 %v1092_v11  ;;  %v1109_v28 = vld [vmem:[%s1460_s7 + $0xb0] sm:$0xff]   ;;  %v1113_v33 = vld [vmem:[%s1460_s7 + $0xb8] sm:$0xff]  }
  0x64   : > { %992 = vmatpush3.bf16.msra.mxu1 %v1093_v12  ;;  %971 = vmatprep.subr.bf16.mxu0 %v1094_v13  ;;  %v918_v34 = vld.sshfl [vmem:[%s1454_s28] sm:$0x33 pattern:$0x75316420]  ;;  %v303_v54 = vld [vmem:[#allocation2] sm:$0x3] }
  0x65   : > { %993 = vmatprep.subr.bf16.mxu1 %v1095_v14  ;;  %v377_v38 = vcombine.high %v918_v34, %v918_v34  ;;  %v384_v42 = vrot.slane %v918_v34, %v383_v40  ;;  %v685_v58 = vld [vmem:[%s1586_s4] sm:$0x3] (!%p951_p12)  ;;  %v955_v10 = vld [vmem:[%s1585_s3 + $0x2] ss:$0 sm:$0xff] (!%p951_p12)  ;;  %v956_v13 = vld [vmem:[%s1585_s3 + $0x3] ss:$0 sm:$0xff] (!%p951_p12) }
  0x66   : > { %vm711_vm0 = vcmp.eq.s32.totalorder (!%p951_p12), %v685_v58, 2  ;;  %vm687_vm1 = vcmp.eq.s32.totalorder (!%p951_p12), %v685_v58, 0  ;;  %vm723_vm2 = vcmp.eq.s32.totalorder (!%p951_p12), %v685_v58, 3  ;;  %vm699_vm3 = vcmp.eq.s32.totalorder (!%p951_p12), %v685_v58, 1  ;;  %v952_v1 = vld [vmem:[%s1584_s2] ss:$0 sm:$0xff] (!%p951_p12) }
  0x67   : > { %972 = vmatpush3.bf16.msra.mxu0 %v1096_v15  ;;  %v391_v41 = vrot.slane %v377_v38, %v383_v40  ;;  %v392_v44 = vcombine.high %v384_v42, %v384_v42  ;;  %v712_v60 = vsel (!%p951_p12), %vm711_vm0, 1, %v1286_v59  ;;  %v688_v61 = vsel (!%p951_p12), %vm687_vm1, 1, %v1286_v59  ;;  %v953_v7 = vld [vmem:[%s1585_s3] ss:$0 sm:$0xff] (!%p951_p12)  ;;  %v954_v8 = vld [vmem:[%s1585_s3 + $0x1] ss:$0 sm:$0xff] (!%p951_p12) }
  0x68   : > { %994 = vmatpush3.bf16.msra.mxu1 %v1097_v16  ;;  %973 = vmatprep.subr.bf16.mxu0 %v1098_v17  ;;  %v724_v62 = vsel (!%p951_p12), %vm723_vm2, 1, %v1286_v59  ;;  %v700_v63 = vsel (!%p951_p12), %vm699_vm3, 1, %v1286_v59 }
  0x69   : > { %995 = vmatprep.subr.bf16.mxu1 %v1099_v18  ;;  %622 = vmatprep.mubr.bf16.mxu0 %v391_v41  ;;  %v393_v43 = vcombine.high %v391_v41, %v391_v41 }
  0x6a   : > { %714 = vperm.xlu1 (!%p951_p12), %1115, %v712_v60   ;;  %690 = vperm.xlu0 (!%p951_p12), %1114, %v688_v61  }
  0x6b   : > { %974 = vmatpush3.bf16.msra.mxu0 %v1100_v19  ;;  %662 = vmatprep.mubr.bf16.mxu1 %v393_v43 }
  0x6c   : > { %996 = vmatpush3.bf16.msra.mxu1 %v1101_v20  ;;  %975 = vmatprep.subr.bf16.mxu0 %v1102_v21 }
  0x6d   : > { %997 = vmatprep.subr.bf16.mxu1 %v1103_v22 }
  0x6e   : > { %726 = vperm.xlu1 (!%p951_p12), %1115, %v724_v62   ;;  %702 = vperm.xlu0 (!%p951_p12), %1114, %v700_v63  }
  0x6f   : > { %976 = vmatpush3.bf16.msra.mxu0 %v1104_v23 }
  0x70   : > { %998 = vmatpush3.bf16.msra.mxu1 %v1105_v24  ;;  %977 = vmatprep.subr.bf16.mxu0 %v1106_v25 }
  0x71   : > { %999 = vmatprep.subr.bf16.mxu1 %v1107_v26 }
  0x73   : > { %978 = vmatpush3.bf16.msra.mxu0 %v1108_v27 }
  0x74   : > { %1000 = vmatpush3.bf16.msra.mxu1 %v1109_v28  ;;  %979 = vmatprep.subr.bf16.mxu0 %v1110_v29 }
  0x75   : > { %1001 = vmatprep.subr.bf16.mxu1 %v1111_v30 }
  0x77   : > { %980 = vmatpush3.bf16.msra.mxu0 %v1112_v32 }
  0x78   : > { %1002 = vmatpush3.bf16.msra.mxu1 %v1113_v33 }
  0x7a   : > { %623 = vmatmul.mubr.bf16.vlgmr.msra.gmra.mrb[0].mxu0 %v384_v42 }
  0x7b   : > { %663 = vmatmul.mubr.bf16.vlgmr.msra.gmra.mrb[0].mxu1 %v392_v44 }
  0xe9   : > { %v715_v5 = vpop.permute.xlu1 (!%p951_p12), %714  ;;  %v691_v6 = vpop.permute.xlu0 (!%p951_p12), %690 }
  0xea   : > { %vm692_vm5 = vcmp.eq.s32.totalorder (!%p951_p12), %v691_v6, 1  ;;  %vm716_vm7 = vcmp.eq.s32.totalorder (!%p951_p12), %v715_v5, 1 }
  0xeb   : > { %v697_v12 = vsel (!%p951_p12), %vm692_vm5, %v953_v7, 0.0 }
  0xed   : > { %v727_v9 = vpop.permute.xlu1 (!%p951_p12), %726  ;;  %v703_v11 = vpop.permute.xlu0 (!%p951_p12), %702 }
  0xee   : > { %vm704_vm6 = vcmp.eq.s32.totalorder (!%p951_p12), %v703_v11, 1  ;;  %vm728_vm8 = vcmp.eq.s32.totalorder (!%p951_p12), %v727_v9, 1 }
  0xef   : > { %v709_v14 = vsel (!%p951_p12), %vm704_vm6, %v954_v8, %v697_v12 }
  0xf0   : > { %v721_v15 = vsel (!%p951_p12), %vm716_vm7, %v955_v10, %v709_v14 }
  0xf1   : > { %v733_v16 = vsel (!%p951_p12), %vm728_vm8, %v956_v13, %v721_v15 }
  0xf2   : > { %v734_v17 = vmax.f32 (!%p951_p12), %v733_v16, 0.0 }
  0xf4   : > { %v737_v18 = vand.u32 (!%p951_p12), 2147483647, %v734_v17 }
  0xf6   : > { %v739_v20 = vsel (!%p951_p12), %vm738_vm4, %v737_v18, 0.0 }
  0xf7   : > { %740 = vadd.xlane.f32.xlu0 (!%p951_p12), %v739_v20 }
 0x14d   : > { %v981_v45 = vpop.f32.mrb[0].mxu0 }
 0x14e   : > { %v982_v46 = vpop.f32.mrb[1].mxu0  ;;  %v1003_v47 = vpop.f32.mrb[0].mxu1 }
 0x14f   : > { %v983_v48 = vadd.f32 %v982_v46, %v981_v45  ;;  %v984_v49 = vpop.f32.mrb[2].mxu0  ;;  %v1004_v50 = vpop.f32.mrb[1].mxu1 }
 0x150   : > { %v985_v51 = vpop.f32.mrb[3].mxu0  ;;  %v1005_v52 = vadd.f32 %v1004_v50, %v1003_v47  ;;  %v1006_v53 = vpop.f32.mrb[2].mxu1  ;;  %675 = sbr.rel (%p951_p12) target bundleno = 697 (0x2b9), region = 56 }
 0x151   : > { %v1007_v55 = vpop.f32.mrb[3].mxu1  ;;  %v790_v51 = vand.u32 (!%p951_p12), 127, %v381_v31 }
 0x152   : > { %v665_v56 = vadd.f32 %v1005_v52, %v983_v48 }
 0x153   : > { %vm791_vm11 = vcmp.eq.s32.totalorder (!%p951_p12), %v790_v51, 0  ;;  %vm794_vm12 = vcmp.eq.s32.totalorder (!%p951_p12), %v790_v51, 1  ;;  %vm798_vm15 = vcmp.eq.s32.totalorder (!%p951_p12), %v790_v51, 2 }
 0x154   : > { %v670_v57 = vadd.f32 %v665_v56, %v303_v54 }
 0x156   : > { %671 = vst [vmem:[#allocation2] sm:$0x3] %v670_v57 }
 0x15d   : > { %v676_v0 = vld [vmem:[#allocation2] sm:$0x3] }
 0x15e   : > { %v684_v2 = vadd.f32 %v952_v1, %v676_v0 }
 0x160   : > { %v749_v3 = vmul.f32 %v684_v2, %v684_v2  ;;  %v735_v19 = vmul.f32 %v734_v17, %v684_v2 }
 0x162   : > { %v750_v4 = vsel %vm738_vm4, %v749_v3, 0.0  ;;  %v769_v21 = vmul.f32 %v735_v19, %v735_v19  ;;  %736 = vst [vmem:[#allocation8] sm:$0x3] %v735_v19 }
 0x163   : > { %751 = vadd.xlane.f32.xlu1 %v750_v4 }
 0x164   : > { %v770_v22 = vsel %vm738_vm4, %v769_v21, 0.0 }
 0x165   : > { %771 = vadd.xlane.f32.xlu0 %v770_v22 }
 0x184   : > { %v741_v27 = vpop.xlane.xlu0 %740 }
 0x185   : > { %v742_v28 = vrot.slane %v741_v27, 4 }
 0x187   : > { %v743_v29 = vadd.f32 %v742_v28, %v741_v27 }
 0x189   : > { %v744_v32 = vrot.slane %v743_v29, 2 }
 0x18b   : > { %v745_v33 = vadd.f32 %v744_v32, %v743_v29 }
 0x18d   : > { %v746_v35 = vrot.slane %v745_v33, 1 }
 0x18f   : > { %v747_v36 = vadd.f32 %v746_v35, %v745_v33 }
 0x191   : > { %1009 = vpush %v747_v36 }
 0x1c2   : > { %s1010_s14 = spop %1009 }
 0x1c3   : > { %v792_v52 = vstv %s1010_s14 }
 0x1c4   : > { %v793_v54 = vsel %vm791_vm11, %v792_v52, 0.0 }
 0x1f0   : > { %v752_v23 = vpop.xlane.xlu1 %751 }
 0x1f1   : > { %v753_v24 = vrot.slane %v752_v23, 4 }
 0x1f2   : > { %v772_v38 = vpop.xlane.xlu0 %771 }
 0x1f3   : > { %v754_v25 = vadd.f32 %v753_v24, %v752_v23  ;;  %v773_v39 = vrot.slane %v772_v38, 4 }
 0x1f5   : > { %v755_v26 = vrot.slane %v754_v25, 2  ;;  %v774_v40 = vadd.f32 %v773_v39, %v772_v38 }
 0x1f7   : > { %v756_v30 = vadd.f32 %v755_v26, %v754_v25  ;;  %v775_v42 = vrot.slane %v774_v40, 2 }
 0x1f9   : > { %v757_v34 = vrot.slane %v756_v30, 1  ;;  %v776_v43 = vadd.f32 %v775_v42, %v774_v40 }
 0x1fb   : > { %v758_v37 = vadd.f32 %v757_v34, %v756_v30  ;;  %v777_v45 = vrot.slane %v776_v43, 1 }
 0x1fd   : > { %1011 = vpush %v758_v37  ;;  %v778_v50 = vadd.f32 %v777_v45, %v776_v43 }
 0x22e   : > { %s1012_s24 = spop %1011 }
 0x22f   : > { %v760_v41 = vstv %s1012_s24 }
 0x230   : > { %1116 = vrsqrt.f32 %v760_v41  ;;  %vm763_vm9 = vcmp.eq.f32.partialorder %v760_v41, inf  ;;  %v766_v47 = vand.u32 2147483648, %v760_v41  ;;  %vm765_vm10 = vcmp.eq.f32.partialorder %v760_v41, 0.0 }
 0x23a   : > { %v1117_v44 = vpop.eup %1116 }
 0x23b   : > { %v762_v46 = vmul.f32 %v1117_v44, %v760_v41 }
 0x23d   : > { %v764_v48 = vsel %vm763_vm9, %v760_v41, %v762_v46 }
 0x23e   : > { %v767_v49 = vsel %vm765_vm10, %v766_v47, %v764_v48 }
 0x23f   : > { %1013 = vpush %v767_v49 }
 0x240   : > { %1015 = vpush %v778_v50 }
 0x270   : > { %s1014_s16 = spop %1013 }
 0x271   : > { %v795_v53 = vstv %s1014_s16  ;;  %s1016_s28 = spop %1015 }
 0x272   : > { %v796_v55 = vsel %vm794_vm12, %v795_v53, 0.0  ;;  %v780_v56 = vstv %s1016_s28 }
 0x273   : > { %v797_v57 = vadd.f32 %v796_v55, %v793_v54  ;;  %1118 = vrsqrt.f32 %v780_v56  ;;  %vm783_vm13 = vcmp.eq.f32.partialorder %v780_v56, inf  ;;  %v786_v60 = vand.u32 2147483648, %v780_v56 }
 0x274   : > { %vm785_vm14 = vcmp.eq.f32.partialorder %v780_v56, 0.0 }
 0x27d   : > { %v1119_v58 = vpop.eup %1118 }
 0x27e   : > { %v782_v59 = vmul.f32 %v1119_v58, %v780_v56 }
 0x280   : > { %v784_v61 = vsel %vm783_vm13, %v780_v56, %v782_v59 }
 0x281   : > { %v787_v62 = vsel %vm785_vm14, %v786_v60, %v784_v61 }
 0x282   : > { %1017 = vpush %v787_v62 }
 0x2b3   : > { %s1018_s8 = spop %1017 }
 0x2b4   : > { %v799_v31 = vstv %s1018_s8 }
 0x2b5   : > { %v800_v63 = vsel %vm798_vm15, %v799_v31, 0.0 }
 0x2b6   : > { %v801_v0 = vadd.f32 %v800_v63, %v797_v57 }
 0x2b8   : > { %802 = vst [vmem:[#allocation9] sm:$0x1] %v801_v0 }
 0x2b9 PF: > { %p1039_p5 = scmp.eq.s32.totalorder %s1343_s25, 1  ;;  %s1287_s15 = smov [#allocation8]  }
 0x2ba   : > { %s810_s7 = sshll.u32 %s1287_s15, 4  ;;  %s1288_s30 = smov [#allocation9]   ;;  %s811_s7 = int_to_ptr.vmem [resolvable:$true] %s810_s7 }
 0x2bb   : > { %s821_s11 = sshll.u32 %s1288_s30, 4  ;;  %s1180_s20 = scalar_lea.vmem %s811_s7, 32  ;;  %s822_s11 = int_to_ptr.vmem [resolvable:$true] %s821_s11 }
 0x2bc   : > { %p1181_p6 = scmp.ne.s32.totalorder %s811_s7, %s1180_s20  ;;  %p1187_p0 = scmp.lt.s32.totalorder %s811_s7, %s811_s7 }
 0x2bd   : > { %p1188_p4 = scmp.lt.s32.totalorder %s1180_s20, %s1180_s20 }
 0x2be   : > { %p1182_p2 = pnand %p1181_p6, %p1039_p5 }
 0x2bf   : > { %p1189_p9 = por %p1188_p4, %p1187_p0 }
 0x2c0   : > { %p1183_p3 = pneg %p1182_p2 }
 0x2c2   : > { %p1190_p10 = pnand %p1189_p9, %p1183_p3 }
 0x2c4   : > { %1193 = shalt.err (!%p1190_p10)
}
 0x2c5   : > { %s1194_s9 = scalar_lea.hbm %s1587_s5, 32 }
 0x2c6   : > { %p1195_p11 = scmp.ne.s32.totalorder %s1587_s5, %s1194_s9  ;;  %p1200_p7 = scmp.lt.u32.totalorder %s1194_s9, %s1587_s5 }
 0x2c8   : > { %p1196_p13 = pnand %p1195_p11, %p1039_p5 }
 0x2ca   : > { %p1197_p1 = pneg %p1196_p13 }
 0x2cc   : > { %p1202_p8 = pnand %p1200_p7, %p1197_p1 }
 0x2ce   : > { %1205 = shalt.err (!%p1202_p8)
}
 0x2cf   : > { %1024 = dma.vmem_to_hbm [thread:$0]  (%p1039_p5), %s811_s7, 32, %s1587_s5, [#allocation5]  }
 0x2d0   : > { %s1206_s14 = scalar_lea.vmem %s822_s11, 16  ;;  %s1212_s24 = scalar_lea.vmem %s822_s11, 32 }
 0x2d1   : > { %p1207_p12 = scmp.ne.s32.totalorder %s822_s11, %s1206_s14  ;;  %p1213_p3 = scmp.lt.s32.totalorder %s822_s11, %s822_s11 }
 0x2d2   : > { %p1214_p0 = scmp.lt.s32.totalorder %s1212_s24, %s1206_s14 }
 0x2d3   : > { %p1208_p6 = pnand %p1207_p12, %p1039_p5 }
 0x2d4   : > { %p1215_p4 = por %p1214_p0, %p1213_p3 }
 0x2d5   : > { %p1209_p2 = pneg %p1208_p6 }
 0x2d7   : > { %p1216_p9 = pnand %p1215_p4, %p1209_p2 }
 0x2d9   : > { %1219 = shalt.err (!%p1216_p9)
}
 0x2da   : > { %s1220_s8 = scalar_lea.hbm %s1588_s6, 16 }
 0x2db   : > { %p1221_p10 = scmp.ne.s32.totalorder %s1588_s6, %s1220_s8  ;;  %p1226_p1 = scmp.lt.u32.totalorder %s1220_s8, %s1588_s6 }
 0x2dd   : > { %p1222_p11 = pnand %p1221_p10, %p1039_p5 }
 0x2df   : > { %p1223_p13 = pneg %p1222_p11 }
 0x2e1   : > { %p1228_p7 = pnand %p1226_p1, %p1223_p13 }
 0x2e3   : > { %1231 = shalt.err (!%p1228_p7)
}
 0x2e4   : > { %1026 = dma.vmem_to_hbm [thread:$0]  (%p1039_p5), %s822_s11, 16, %s1588_s6, [#allocation10]  }
 0x2e5   : > { %1257 = dma.done.wait (%p1039_p5), [#allocation5], 32  }
 0x2e6   : > { %1259 = vsyncadd (%p1039_p5), [#allocation5], 4294967264 }
 0x2e7   : > { %1261 = dma.done.wait (%p1039_p5), [#allocation10], 16  }
 0x2e8   : > { %1263 = vsyncadd (%p1039_p5), [#allocation10], 4294967280 }
 0x2e9 PF: > { %p22_p8 = scmp.ge.s32.totalorder %s1346_s26, 4   ;;  %s1596_s21 = smov %s1270_s22 }
 0x2ea   : > { %s1597_s22 = smov %s1274_s23  ;;  %s1598_s23 = smov %s1356_s29 }
 0x2eb   : > { %s1599_s24 = smov %s1346_s26  ;;  %24 = sbr.rel (!%p22_p8) target bundleno = 7 (0x7), region = 106 }
 0x2f2   :  { %838 = vsyncpa [#allocation4], 1 }
 0x2f3   :  { %840 = vsyncpa [#allocation4 + $0x1], 1 }
 0x2f4   :  { %841 = vsyncpa [#allocation7], 1 }
 0x2f5   :  { %843 = vsyncpa [#allocation7 + $0x1], 1 }
 0x2f6   :  { %844 = vsyncpa [#allocation5], 1 }
 0x2f7   :  { %846 = vsyncpa [#allocation5 + $0x1], 1 }
 0x2f8   :  { %847 = vsyncpa [#allocation10], 1 }

</bundles_post_ra>
